<compile_context>
chip_gen: v7x
topology: tpu7x:2x2x1
jax: 0.10.0
libtpu: 0.0.40
codegen_flags: <defaults>
</compile_context>

<pallas_src>
import jax
import jax.numpy as jnp
from jax.experimental import pallas as pl
from jax.experimental.pallas import tpu as pltpu


# ---------------------------------------------------------------------------
# helpers
# ---------------------------------------------------------------------------

def _round_up(n, m):
    return ((n + m - 1) // m) * m


def _pad_axis(a, axis, new_size):
    if new_size <= a.shape[axis]:
        return a
    pad = [(0, 0)] * a.ndim
    pad[axis] = (0, new_size - a.shape[axis])
    return jnp.pad(a, pad)


def _vmem_budget_bytes():
    """~80% of the chip's physical VMEM (generation-aware), conservative fallback."""
    try:
        cap = pltpu.get_tpu_info().vmem_capacity_bytes
    except Exception:
        # Info query failed (e.g. emulator): assume the smallest generation (v7x, 64 MiB).
        cap = 64 << 20
    return int(cap * 0.8)


def _buffered_supported():
    """Does this jax build accept pipeline_mode=pl.Buffered(1) on a BlockSpec?"""
    try:
        pl.BlockSpec((8, 128), lambda i: (0, 0), pipeline_mode=pl.Buffered(1))
        return True
    except (TypeError, AttributeError):
        return False


def _resident_bytes(tm, ti, E, itemsize, nj, buffered_ok):
    """Upper bound on VMEM resident set for one grid step."""
    weight_bufs = 1 if (nj == 1 and buffered_ok) else 2
    io = 2 * 2 * tm * E * itemsize                                  # x + out, double-buffered
    w = weight_bufs * (E * 2 * ti + 2 * ti + ti * E + E) * itemsize  # [W1|W2], [b1|b2], Wp, bp
    acc = tm * E * 4                                                 # f32 accumulator
    # h (f32), gate product (f32), gated cast — conservative bound on temporaries.
    temps = tm * 2 * ti * 4 + tm * ti * 4 + tm * ti * itemsize
    return io + w + acc + temps + (2 << 20)                          # +2 MiB slack


def _select_tiles(M, E, I_pad, itemsize, budget, tile_m, tile_i, sublane, buffered_ok):
    """Pick (tm, ti) against the per-generation VMEM budget.

    Preference: weights-resident (nj == 1, weights DMA'd once) at a decent tm,
    else the largest tm with the largest fitting lane-aligned ti divisor.
    """
    # Default M tile above the HBM roofline knee; bigger on 128-MiB chips.
    if tile_m is None:
        tm_target = 1024 if budget >= (80 << 20) else 512
    else:
        tm_target = tile_m
    tm_cap = _round_up(min(tm_target, M), sublane)
    ti_cap = I_pad if tile_i is None else min(I_pad, _round_up(tile_i, 128))

    def fits(tm, ti):
        nj = I_pad // ti
        return _resident_bytes(tm, ti, E, itemsize, nj, buffered_ok) <= budget

    # Candidate tm values: tm_cap halving down to the sublane.
    tms = []
    t = tm_cap
    while True:
        tms.append(t)
        if t <= sublane:
            break
        t = max(sublane, _round_up(t // 2, sublane))

    # 1) Weights-resident: eliminates per-M-tile weight re-streaming entirely.
    if ti_cap >= I_pad:
        tm_floor = min(256, tm_cap)
        for tm in tms:
            if tm >= tm_floor and fits(tm, I_pad):
                return tm, I_pad

    # 2) Stream the intermediate dim: biggest tm, then biggest fitting ti
    #    (ti must be a 128-multiple divisor of the padded I).
    for tm in tms:
        ti = (min(ti_cap, I_pad) // 128) * 128
        while ti >= 128:
            if I_pad % ti == 0 and fits(tm, ti):
                return tm, ti
            ti -= 128

    # 3) Last resort: smallest tiles; let the compiler report if even this is too big.
    return sublane, min(128, I_pad)


def _pack_w12(w1, w2, ti):
    """Interleave W1/W2 per I-tile: block j of width 2*ti = [W1 tile j | W2 tile j]."""
    E, I = w1.shape
    nj = I // ti
    w12 = jnp.stack([w1.reshape(E, nj, ti), w2.reshape(E, nj, ti)], axis=2)
    return w12.reshape(E, 2 * I)


def _pack_b12(b1, b2, ti):
    I = b1.shape[1]
    nj = I // ti
    b12 = jnp.stack([b1.reshape(1, nj, ti), b2.reshape(1, nj, ti)], axis=2)
    return b12.reshape(1, 2 * I)


# ---------------------------------------------------------------------------
# kernel + pallas_call builder
# ---------------------------------------------------------------------------

def _build_ffn_call(M, E, I_pad, tm, ti, dtype, vmem_limit, single_buffer_invariant):
    ni = pl.cdiv(M, tm)
    nj = I_pad // ti
    itemsize = jnp.dtype(dtype).itemsize

    def ffn_kernel(x_ref, w12_ref, b12_ref, wp_ref, bp_ref, o_ref, acc_ref):
        """o = (silu(x @ W1 + b1) * (x @ W2 + b2)) @ Wp + bp, tiled over (M, I)."""
        j = pl.program_id(1)

        @pl.when(j == 0)
        def _():
            # Fold the proj bias into the accumulator init: the epilogue becomes
            # a pure cast/store (frees the single vst slot on v5e).
            acc_ref[...] = jnp.broadcast_to(
                bp_ref[...].astype(jnp.float32), acc_ref.shape)

        x = x_ref[...]                                                # (tm, E)

        # Single fused MXU pass for ln1 || ln2 (weights packed per I-tile in the
        # wrapper), then a static lane-aligned split.
        h = jnp.dot(x, w12_ref[...],
                    preferred_element_type=jnp.float32) + b12_ref[...]   # (tm, 2*ti)
        h1 = h[:, :ti]
        h2 = h[:, ti:]
        # SiLU gate; cast to the input dtype so the proj matmul runs at the
        # native MXU rate for bf16 inputs (deliberate precision trade vs f32).
        gated = (h1 * jax.nn.sigmoid(h1) * h2).astype(x.dtype)           # (tm, ti)

        acc_ref[...] += jnp.dot(gated, wp_ref[...],
                                preferred_element_type=jnp.float32)      # (tm, E)

        @pl.when(j == nj - 1)
        def _():
            # Dropout: identity at inference time.
            o_ref[...] = acc_ref[...].astype(o_ref.dtype)

    def invariant_spec(shape, index_map):
        # Block index never changes across the grid -> one buffer is enough.
        if single_buffer_invariant:
            return pl.BlockSpec(shape, index_map, pipeline_mode=pl.Buffered(1))
        return pl.BlockSpec(shape, index_map)

    # Weights/biases are grid-invariant only when the intermediate dim is untiled.
    wspec = invariant_spec if nj == 1 else pl.BlockSpec

    in_specs = [
        pl.BlockSpec((tm, E), lambda i, j: (i, 0)),        # x rows (pipelined over i)
        wspec((E, 2 * ti), lambda i, j: (0, j)),           # [W1 | W2] per I-tile
        wspec((1, 2 * ti), lambda i, j: (0, j)),           # [b1 | b2] per I-tile
        wspec((ti, E), lambda i, j: (j, 0)),               # Wp rows
        invariant_spec((1, E), lambda i, j: (0, 0)),       # bp (always invariant)
    ]

    # Honest traffic estimate: streamed weights are re-read once per M tile.
    weight_reads = 1 if nj == 1 else ni

    return pl.pallas_call(
        ffn_kernel,
        out_shape=jax.ShapeDtypeStruct((M, E), dtype),
        grid_spec=pltpu.PrefetchScalarGridSpec(
            num_scalar_prefetch=0,
            grid=(ni, nj),                                  # reduction axis (I) last
            in_specs=in_specs,
            out_specs=pl.BlockSpec((tm, E), lambda i, j: (i, 0)),
            scratch_shapes=[pltpu.VMEM((tm, E), jnp.float32)],
        ),
        compiler_params=pltpu.CompilerParams(
            dimension_semantics=("parallel", "arbitrary"),
            vmem_limit_bytes=int(vmem_limit),
        ),
        cost_estimate=pl.CostEstimate(
            flops=6 * M * E * I_pad,                        # three matmuls
            transcendentals=M * I_pad,                      # sigmoid
            bytes_accessed=(2 * M * E
                            + weight_reads * (3 * E * I_pad + 2 * I_pad)
                            + E) * itemsize,
        ),
    )


# ---------------------------------------------------------------------------
# wrapper
# ---------------------------------------------------------------------------

def ffn_pallas(x, w1, b1, w2, b2, wp, bp, *, tile_m=None, tile_i=None):
    """x: (B, S, E); weights are (in, out); biases are (1, out).

    tile_m / tile_i = None -> auto (VMEM-budget-aware, weights-resident if they
    fit). Explicit values act as caps.
    """
    B, S, E = x.shape
    I = w1.shape[1]
    M = B * S
    dtype = x.dtype

    itemsize = jnp.dtype(dtype).itemsize
    sublane = max(8, 32 // itemsize)                        # 8 f32 / 16 bf16 / 32 int8

    # Zero-pad the intermediate dim to a lane multiple so a lane-aligned ti always
    # exists.  Padding is exact: silu(0 + 0) * (0 + 0) = 0 feeds zero rows of Wp.
    I_pad = _round_up(I, 128)
    if I_pad != I:
        w1 = _pad_axis(w1, 1, I_pad)
        b1 = _pad_axis(b1, 1, I_pad)
        w2 = _pad_axis(w2, 1, I_pad)
        b2 = _pad_axis(b2, 1, I_pad)
        wp = _pad_axis(wp, 0, I_pad)

    budget = _vmem_budget_bytes()
    buffered_ok = _buffered_supported()
    tm, ti = _select_tiles(M, E, I_pad, itemsize, budget,
                           tile_m, tile_i, sublane, buffered_ok)

    # v7x megacore: when weights are resident, splitting M is free in HBM traffic;
    # make sure the "parallel" axis has >= 2 steps so both TensorCores get work.
    # (Only in auto mode; an explicit tile_m is respected.)
    if tile_m is None and ti == I_pad and pl.cdiv(M, tm) < 2 and M > sublane:
        tm = _round_up(pl.cdiv(M, 2), sublane)

    # TODO(synk): optional wrapper-side bf16 cast of f32 inputs/weights for v5e
    # MXU throughput (kept off to preserve the module's f32 semantics).

    x2d = x.reshape(M, E)
    w12 = _pack_w12(w1, w2, ti)
    b12 = _pack_b12(b1, b2, ti)
    args = (x2d, w12, b12, wp, bp)

    call = _build_ffn_call(M, E, I_pad, tm, ti, dtype, budget,
                           single_buffer_invariant=buffered_ok)
    try:
        out2d = jax.jit(call)(*args)
    except (TypeError, NotImplementedError, pltpu.LoweringException):
        if not buffered_ok:
            raise
        # pipeline_mode=pl.Buffered(1) rejected by this lowering: fall back to
        # default double buffering (correctness unchanged, slightly more VMEM).
        call = _build_ffn_call(M, E, I_pad, tm, ti, dtype, budget,
                               single_buffer_invariant=False)
        out2d = jax.jit(call)(*args)
    return out2d.reshape(B, S, E)


def ffn_reference(x, w1, b1, w2, b2, wp, bp):
    h1 = x @ w1 + b1
    h2 = x @ w2 + b2
    return (jax.nn.silu(h1) * h2) @ wp + bp


# ---------------------------------------------------------------------------
# self-test
# ---------------------------------------------------------------------------

if __name__ == "__main__":
    dtype = jnp.float32

    def linear_params(kw, kb, fan_in, fan_out):
        # PyTorch nn.Linear init: U(-1/sqrt(fan_in), 1/sqrt(fan_in)); weights are
        # kept pre-transposed as (in, out) so the kernel computes x @ W.
        bound = 1.0 / (fan_in ** 0.5)
        w = jax.random.uniform(kw, (fan_in, fan_out), dtype, -bound, bound)
        b = jax.random.uniform(kb, (1, fan_out), dtype, -bound, bound)
        return w, b

    def run_case(key, batch, seq, embed, inter, tol, **tiles):
        kx, k1, kb1, k2, kb2, kp, kbp = jax.random.split(key, 7)
        x = jax.random.normal(kx, (batch, seq, embed), dtype)
        w1, b1 = linear_params(k1, kb1, embed, inter)   # ln1
        w2, b2 = linear_params(k2, kb2, embed, inter)   # ln2
        wp, bp = linear_params(kp, kbp, inter, embed)   # proj

        out = ffn_pallas(x, w1, b1, w2, b2, wp, bp, **tiles)
        out = jax.block_until_ready(out)
        ref = ffn_reference(x, w1, b1, w2, b2, wp, bp)
        assert out.shape == (batch, seq, embed)
        err = float(jnp.max(jnp.abs(out - ref)))
        # f32 MXU passes may reorder accumulation vs. the single XLA dot.
        assert err < tol, f"mismatch vs reference: max abs err {err}"

    key = jax.random.PRNGKey(0)
    k_a, k_b = jax.random.split(key)

    # (a) ModelConfig-like small dims, auto tiling: weights-resident path,
    #     I zero-padded 64 -> 128, M split into 2 row tiles for the parallel axis.
    run_case(k_a, batch=2, seq=8, embed=32, inter=64, tol=1e-4)
    # (b) multi-tile path: explicit tiles force 2 row tiles x 2 intermediate
    #     tiles, exercising the f32 accumulator init/accumulate/finalize and
    #     lane-dense (128) feature dims.
    run_case(k_b, batch=2, seq=64, embed=128, inter=256, tol=1e-3,
             tile_m=64, tile_i=128)

    print("KERNEL_OK")
</pallas_src>

<mosaic_0001>
module attributes {stable_mosaic.version = 11 : i64} {
  func.func @ffn_kernel(%arg0: i32, %arg1: i32, %arg2: memref<8x32xf32, #tpu.memory_space<vmem>>, %arg3: memref<32x256xf32, #tpu.memory_space<vmem>>, %arg4: memref<1x256xf32, #tpu.memory_space<vmem>>, %arg5: memref<128x32xf32, #tpu.memory_space<vmem>>, %arg6: memref<1x32xf32, #tpu.memory_space<vmem>>, %arg7: memref<8x32xf32, #tpu.memory_space<vmem>>, %arg8: memref<8x32xf32, #tpu.memory_space<vmem>>) attributes {dimension_semantics = [#tpu.dimension_semantics<parallel>, #tpu.dimension_semantics<arbitrary>], iteration_bounds = array<i64: 2, 1>, scalar_prefetch = 0 : i64, scratch_operands = 1 : i64, tpu.core_type = #tpu.core_type<tc>, window_params = [{transform_indices = @transform_0, window_bounds = array<i64: 8, 32>}, {pipeline_mode = #tpu.pipeline_mode<synchronous>, transform_indices = @transform_1, window_bounds = array<i64: 32, 256>}, {pipeline_mode = #tpu.pipeline_mode<synchronous>, transform_indices = @transform_2, window_bounds = array<i64: 1, 256>}, {pipeline_mode = #tpu.pipeline_mode<synchronous>, transform_indices = @transform_3, window_bounds = array<i64: 128, 32>}, {pipeline_mode = #tpu.pipeline_mode<synchronous>, transform_indices = @transform_4, window_bounds = array<i64: 1, 32>}, {transform_indices = @transform_5, window_bounds = array<i64: 8, 32>}]} {
    %c0_i32 = arith.constant 0 : i32
    %0 = arith.cmpi eq, %arg1, %c0_i32 : i32
    %1 = arith.extui %0 : i1 to i32
    %c0_i32_0 = arith.constant 0 : i32
    %2 = arith.cmpi ne, %1, %c0_i32_0 : i32
    scf.if %2 {
      %c0_16 = arith.constant 0 : index
      %c0_17 = arith.constant 0 : index
      %26 = vector.load %arg6[%c0_16, %c0_17] : memref<1x32xf32, #tpu.memory_space<vmem>>, vector<1x32xf32>
      %27 = vector.shape_cast %26 : vector<1x32xf32> to vector<1x32xf32>
      %28 = vector.broadcast %27 : vector<1x32xf32> to vector<8x32xf32>
      %c0_18 = arith.constant 0 : index
      %c0_19 = arith.constant 0 : index
      %29 = vector.load %arg8[%c0_18, %c0_19] : memref<8x32xf32, #tpu.memory_space<vmem>>, vector<8x32xf32>
      tpu.vector_store %arg8[%c0_18, %c0_19], %28 {strides = array<i32>} : memref<8x32xf32, #tpu.memory_space<vmem>>, vector<8x32xf32>,
    } else {
    }
    %c0 = arith.constant 0 : index
    %c0_1 = arith.constant 0 : index
    %3 = vector.load %arg2[%c0, %c0_1] : memref<8x32xf32, #tpu.memory_space<vmem>>, vector<8x32xf32>
    %c0_2 = arith.constant 0 : index
    %c0_3 = arith.constant 0 : index
    %4 = vector.load %arg3[%c0_2, %c0_3] : memref<32x256xf32, #tpu.memory_space<vmem>>, vector<32x256xf32>
    %cst = arith.constant dense<0.000000e+00> : vector<8x256xf32>
    %5 = tpu.matmul %3, %4, %cst {dimension_numbers = #tpu.dot_dimension_numbers<[1], [0], [0], [1], [0, 0, 1, 1], [], []>} : vector<8x32xf32>, vector<32x256xf32>, vector<8x256xf32> -> vector<8x256xf32>
    %c0_4 = arith.constant 0 : index
    %c0_5 = arith.constant 0 : index
    %6 = vector.load %arg4[%c0_4, %c0_5] : memref<1x256xf32, #tpu.memory_space<vmem>>, vector<1x256xf32>
    %7 = vector.broadcast %6 : vector<1x256xf32> to vector<8x256xf32>
    %8 = arith.addf %5, %7 : vector<8x256xf32>
    %9 = vector.extract_strided_slice %8 {offsets = [0, 0], sizes = [8, 128], strides = [1, 1]} : vector<8x256xf32> to vector<8x128xf32>
    %10 = vector.extract_strided_slice %8 {offsets = [0, 128], sizes = [8, 128], strides = [1, 1]} : vector<8x256xf32> to vector<8x128xf32>
    %11 = arith.negf %9 : vector<8x128xf32>
    %12 = math.exp %11 : vector<8x128xf32>
    %cst_6 = arith.constant 1.000000e+00 : f32
    %13 = vector.broadcast %cst_6 : f32 to vector<8x128xf32>
    %14 = arith.addf %13, %12 : vector<8x128xf32>
    %15 = arith.divf %13, %14 : vector<8x128xf32>
    %16 = arith.mulf %9, %15 : vector<8x128xf32>
    %17 = arith.mulf %16, %10 : vector<8x128xf32>
    %c0_7 = arith.constant 0 : index
    %c0_8 = arith.constant 0 : index
    %18 = vector.load %arg8[%c0_7, %c0_8] : memref<8x32xf32, #tpu.memory_space<vmem>>, vector<8x32xf32>
    %c0_9 = arith.constant 0 : index
    %c0_10 = arith.constant 0 : index
    %19 = vector.load %arg5[%c0_9, %c0_10] : memref<128x32xf32, #tpu.memory_space<vmem>>, vector<128x32xf32>
    %cst_11 = arith.constant dense<0.000000e+00> : vector<8x32xf32>
    %20 = tpu.matmul %17, %19, %cst_11 {dimension_numbers = #tpu.dot_dimension_numbers<[1], [0], [0], [1], [0, 0, 1, 1], [], []>} : vector<8x128xf32>, vector<128x32xf32>, vector<8x32xf32> -> vector<8x32xf32>
    %21 = arith.addf %18, %20 : vector<8x32xf32>
    %c0_12 = arith.constant 0 : index
    %c0_13 = arith.constant 0 : index
    %22 = vector.load %arg8[%c0_12, %c0_13] : memref<8x32xf32, #tpu.memory_space<vmem>>, vector<8x32xf32>
    tpu.vector_store %arg8[%c0_12, %c0_13], %21 {strides = array<i32>} : memref<8x32xf32, #tpu.memory_space<vmem>>, vector<8x32xf32>,
    %c0_i32_14 = arith.constant 0 : i32
    %23 = arith.cmpi eq, %arg1, %c0_i32_14 : i32
    %24 = arith.extui %23 : i1 to i32
    %c0_i32_15 = arith.constant 0 : i32
    %25 = arith.cmpi ne, %24, %c0_i32_15 : i32
    scf.if %25 {
      %c0_16 = arith.constant 0 : index
      %c0_17 = arith.constant 0 : index
      %26 = vector.load %arg8[%c0_16, %c0_17] : memref<8x32xf32, #tpu.memory_space<vmem>>, vector<8x32xf32>
      %c0_18 = arith.constant 0 : index
      %c0_19 = arith.constant 0 : index
      %27 = vector.load %arg7[%c0_18, %c0_19] : memref<8x32xf32, #tpu.memory_space<vmem>>, vector<8x32xf32>
      tpu.vector_store %arg7[%c0_18, %c0_19], %26 {strides = array<i32>} : memref<8x32xf32, #tpu.memory_space<vmem>>, vector<8x32xf32>,
    } else {
    }
    return
  }
  func.func @transform_0(%arg0: i32, %arg1: i32) -> (i32, i32) {
    %c0_i32 = arith.constant 0 : i32
    %c0_i32_0 = arith.constant 0 : i32
    return %arg0, %c0_i32 : i32, i32
  }
  func.func @transform_1(%arg0: i32, %arg1: i32) -> (i32, i32) {
    %c0_i32 = arith.constant 0 : i32
    %c0_i32_0 = arith.constant 0 : i32
    return %c0_i32, %arg1 : i32, i32
  }
  func.func @transform_2(%arg0: i32, %arg1: i32) -> (i32, i32) {
    %c0_i32 = arith.constant 0 : i32
    %c0_i32_0 = arith.constant 0 : i32
    return %c0_i32, %arg1 : i32, i32
  }
  func.func @transform_3(%arg0: i32, %arg1: i32) -> (i32, i32) {
    %c0_i32 = arith.constant 0 : i32
    %c0_i32_0 = arith.constant 0 : i32
    return %arg1, %c0_i32 : i32, i32
  }
  func.func @transform_4(%arg0: i32, %arg1: i32) -> (i32, i32) {
    %c0_i32 = arith.constant 0 : i32
    %c0_i32_0 = arith.constant 0 : i32
    %c0_i32_1 = arith.constant 0 : i32
    return %c0_i32, %c0_i32_0 : i32, i32
  }
  func.func @transform_5(%arg0: i32, %arg1: i32) -> (i32, i32) {
    %c0_i32 = arith.constant 0 : i32
    %c0_i32_0 = arith.constant 0 : i32
    return %arg0, %c0_i32 : i32, i32
  }
}

</mosaic_0001>

<bundles_post_ra>
// kernel: tpu_custom_call.1
= control target key start
LH: loop header
LB: loop body
LE: loop exit
PB: predicated region body
PF: predicated region fallthrough
CT: control target
= control target key end

     0   :  { %10 = vsyncpa [#allocation4], 0  ;;  %s1100_s0 = inlined_call_operand.vmem [shape: f32[16,32], index: 0, kind: input, shape index: {}]   ;;  %s1101_s1 = inlined_call_operand.vmem [shape: f32[32,256], index: 1, kind: input, shape index: {}]   ;;  %s1102_s2 = inlined_call_operand.vmem [shape: f32[1,256], index: 2, kind: input, shape index: {}]   ;;  %s1103_s3 = inlined_call_operand.vmem [shape: f32[128,32], index: 3, kind: input, shape index: {}]   ;;  %s1104_s4 = inlined_call_operand.vmem [shape: f32[1,32], index: 4, kind: input, shape index: {}]   ;;  %s1105_s5 = inlined_call_operand.hbm [shape: f32[16,32], index: 5, kind: output, shape index: {}]  }
   0x1   :  { %12 = vsyncpa [#allocation4 + $0x1], 0  ;;  %s906_s18 = smov 0   ;;  %s908_s19 = smov 0  }
   0x2   :  { %s910_s20 = smov 0   ;;  %s912_s21 = smov 0  }
   0x3   :  { %s914_s22 = smov 0   ;;  %s916_s23 = smov 0  }
   0x4 LB: > { %s629_s24 = sadd.s32 4294967295, %s870_s23   ;;  %s630_s25 = sadd.s32 4294967294, %s870_s23   ;;  %s870_s23 = sphi %s916_s23, %s18_s23   ;;  %s866_s22 = sphi %s914_s22, %s1112_s22   ;;  %s862_s21 = sphi %s912_s21, %s1111_s21   ;;  %s858_s20 = sphi %s910_s20, %s1110_s20   ;;  %s854_s19 = sphi %s908_s19, %s1109_s19   ;;  %s850_s18 = sphi %s906_s18, %s1108_s18  }
   0x5   : > { %s30_s26 = sadd.s32 1, %s866_s22  ;;  %s162_s27 = sadd.s32 1, %s858_s20 }
   0x6   : > { %p32_p0 = scmp.ge.s32.totalorder %s30_s26, 2  ;;  %p172_p1 = scmp.ne.s32.totalorder %s858_s20, %s854_s19 }
   0x7   : > { %p173_p2 = scmp.eq.s32.totalorder %s629_s24, 1  ;;  %p178_p3 = scmp.ne.s32.totalorder %s854_s19, %s850_s18 }
   0x8   : > { %s1114_s26 = smov (%p32_p0, %s30_s26), 0  ;;  %p179_p5 = scmp.eq.s32.totalorder %s630_s25, 1 }
   0x9   : > { %p946_p4 = por %p173_p2, %p172_p1  ;;  %s159_s29 = ssub.s32 %s866_s22, %s1114_s26 }
   0xa   : > { %p636_p6 = scmp.ge.s32.totalorder %s870_s23, 1  ;;  %p160_p7 = scmp.eq.s32.totalorder %s159_s29, 0 }
   0xb   : > { %p953_p8 = por %p179_p5, %p178_p3  ;;  %p233_p9 = scmp.lt.s32.totalorder %s870_s23, 3 }
   0xc   : > { %s959_s6 = scalar_select %p160_p7, %s858_s20, %s162_s27  }
   0xd   : > { %p234_p10 = pnand %p636_p6, %p233_p9 }
   0xe   : > { %v310_v0 = vld [vmem:[%s1101_s1 + $0x8] sm:$0xff] (!%p234_p10)  ;;  %v312_v1 = vld [vmem:[%s1101_s1 + $0x18] sm:$0xff] (!%p234_p10)  ;;  %v309_v2 = vld [vmem:[%s1101_s1] sm:$0xff] (!%p234_p10)  ;;  %p274_p11 = scmp.lt.s32.totalorder (!%p234_p10), %s862_s21, 1  ;;  %v872_v7 = vmov (!%p234_p10), 0.0   ;;  %vm306_vm0 = vcmask (!%p234_p10), 261120   ;;  %v319_v40 = vlaneseq (!%p234_p10) }
   0xf   : > { %237 = sbr.rel (%p234_p10) target bundleno = 507 (0x1fb), region = 40  ;;  %v698_v3 = vpack.c.bf16 (!%p234_p10), %v312_v1, %v310_v0  ;;  %v311_v4 = vld [vmem:[%s1101_s1 + $0x10] sm:$0xff] (!%p234_p10)  ;;  %v314_v5 = vld [vmem:[%s1101_s1 + $0x28] sm:$0xff] (!%p234_p10)  ;;  %v316_v6 = vld [vmem:[%s1101_s1 + $0x38] sm:$0xff] (!%p234_p10)  ;;  %397 = vmatprep.mubr.f32.mxu0 (!%p234_p10), %v872_v7  ;;  %v873_v18 = vmov (!%p234_p10), 0.0|0.0   ;;  %vm874_vm1 = vmmov (!%p234_p10), 0  }
  0x10   : > { %v700_v8 = vpack.c.bf16 (!%p234_p10), %v311_v4, %v309_v2  ;;  %v702_v9 = vpack.c.bf16 (!%p234_p10), %v316_v6, %v314_v5  ;;  %v313_v10 = vld [vmem:[%s1101_s1 + $0x20] sm:$0xff] (!%p234_p10)  ;;  %v315_v11 = vld [vmem:[%s1101_s1 + $0x30] sm:$0xff] (!%p234_p10)  ;;  %v414_v16 = vld [vmem:[%s1103_s3 + $0x8] sm:$0xff] (!%p234_p10)  ;;  %706 = vmatprep.subr.bf16.mxu1 (!%p234_p10), %v873_v18  ;;  %695 = vmatprep.mubr.msk.f32.mxu1 (!%p234_p10), %vm874_vm1, %v872_v7  ;;  %v320_v41 = vshrl.u32 (!%p234_p10), %v319_v40, 7  ;;  %s271_s25 = sand.u32 (!%p234_p10), 1, %s854_s19   ;;  %s643_s29 = sshll.u32 (!%p234_p10), %s862_s21, 7 }
  0x11   : > { %v639_v12 = vld [vmem:[%s1104_s4] ss:$0 sm:$0xff] (!%p234_p10)  ;;  %699 = vmatprep.subr.bf16.mxu0 (!%p234_p10), %v698_v3  ;;  %v704_v13 = vpack.c.bf16 (!%p234_p10), %v315_v11, %v313_v10  ;;  %v415_v19 = vld [vmem:[%s1103_s3 + $0x10] sm:$0xff] (!%p234_p10)  ;;  %v416_v20 = vld [vmem:[%s1103_s3 + $0x18] sm:$0xff] (!%p234_p10)  ;;  %s637_s27 = sshll.u32 (!%p234_p10), %s271_s25, 3  ;;  %s507_s12 = scalar_lea.sflag (!%p234_p10), [#allocation4], %s271_s25 }
  0x12   : > { %307 = vst.msk [vmem:[#allocation2] sm:$0xff] (!%p234_p10), %vm306_vm0, %v639_v12  ;;  %701 = vmatpush1.bf16.msra.mxu0 (!%p234_p10), %v700_v8  ;;  %v413_v15 = vld [vmem:[%s1103_s3] sm:$0xff] (!%p234_p10)  ;;  %v710_v21 = vpack.c.bf16 (!%p234_p10), %v416_v20, %v415_v19  ;;  %v418_v23 = vld [vmem:[%s1103_s3 + $0x28] sm:$0xff] (!%p234_p10)  ;;  %v419_v25 = vld [vmem:[%s1103_s3 + $0x30] sm:$0xff] (!%p234_p10)  ;;  %v321_v42 = vsub.s32 (!%p234_p10), 0, %v320_v41  ;;  %v325_v51 = vsub.s32 (!%p234_p10), 1, %v320_v41 }
  0x13   : > { %703 = vmatprep.subr.bf16.mxu0 (!%p234_p10), %v702_v9  ;;  %v707_v17 = vpack.c.bf16 (!%p234_p10), %v414_v16, %v413_v15  ;;  %v417_v22 = vld [vmem:[%s1103_s3 + $0x20] sm:$0xff] (!%p234_p10)  ;;  %v420_v26 = vld [vmem:[%s1103_s3 + $0x38] sm:$0xff] (!%p234_p10)  ;;  %v422_v29 = vld [vmem:[%s1103_s3 + $0x48] sm:$0xff] (!%p234_p10)  ;;  %s273_s7 = scalar_lea.vmem (!%p234_p10), [#allocation3], %s637_s27 }
  0x14   : > { %v713_v24 = vpack.c.bf16 (!%p234_p10), %v418_v23, %v417_v22  ;;  %v716_v27 = vpack.c.bf16 (!%p234_p10), %v420_v26, %v419_v25  ;;  %v421_v28 = vld [vmem:[%s1103_s3 + $0x40] sm:$0xff] (!%p234_p10)  ;;  %v423_v31 = vld [vmem:[%s1103_s3 + $0x50] sm:$0xff] (!%p234_p10)  ;;  %v424_v32 = vld [vmem:[%s1103_s3 + $0x58] sm:$0xff] (!%p234_p10) }
  0x15   : > { %708 = vmatpush3.bf16.msra.mxu1 (!%p234_p10), %v707_v17  ;;  %v719_v30 = vpack.c.bf16 (!%p234_p10), %v422_v29, %v421_v28  ;;  %v722_v33 = vpack.c.bf16 (!%p234_p10), %v424_v32, %v423_v31  ;;  %v425_v34 = vld [vmem:[%s1103_s3 + $0x60] sm:$0xff] (!%p234_p10)  ;;  %v426_v35 = vld [vmem:[%s1103_s3 + $0x68] sm:$0xff] (!%p234_p10)  ;;  %v427_v37 = vld [vmem:[%s1103_s3 + $0x70] sm:$0xff] (!%p234_p10) }
  0x16   : > { %s275_s8 = scalar_select %p274_p11, %s862_s21, 1  ;;  %705 = vmatpush1.bf16.msra.mxu0 %v704_v13  ;;  %709 = vmatprep.subr.bf16.mxu1 %v873_v18  ;;  %v725_v36 = vpack.c.bf16 %v426_v35, %v425_v34  ;;  %v428_v38 = vld [vmem:[%s1103_s3 + $0x78] sm:$0xff]  ;;  %v317_v43 = vld [vmem:[%s1102_s2] sm:$0x3] }
  0x17   : > { %v728_v39 = vpack.c.bf16 %v428_v38, %v427_v37  ;;  %v322_v44 = vrot.slane %v317_v43, %v321_v42  ;;  %v326_v52 = vrot.slane %v317_v43, %v325_v51  ;;  %s875_s21 = smov [#allocation3]  }
  0x18   : > { %s638_s11 = sshll.u32 %s275_s8, 3  ;;  %s520_s8 = sshll.u32 %s273_s7, 4  ;;  %s1054_s8 = int_to_ptr.vmem [resolvable:$true] %s520_s8 }
  0x19   : > { %s277_s14 = scalar_lea.vmem %s1100_s0, %s638_s11  ;;  %711 = vmatpush3.bf16.msra.mxu1 %v710_v21  ;;  %v412_v57 = vld [vmem:[#allocation2] sm:$0xff]  ;;  %s1052_s11 = scalar_lea.hbm %s1105_s5, %s643_s29 }
  0x1a   : > { %v308_v14 = vld [vmem:[%s277_s14] sm:$0xff]  ;;  %712 = vmatprep.subr.bf16.mxu1 %v873_v18  ;;  %s792_s13 = scalar_lea.vmem %s1054_s8, 128  ;;  %s796_s14 = sshll.u32 %s875_s21, 4  ;;  %s797_s14 = int_to_ptr.vmem [resolvable:$false] %s796_s14 }
  0x1b   : > { %640 = vmatmul.mubr.msk.f32.vlgmr.msra.gmra.mrb[0].mxu0 %vm306_vm0, %v308_v14  ;;  %p793_p12 = scmp.ne.s32.totalorder %s1054_s8, %s792_s13  ;;  %s798_s15 = scalar_lea.vmem %s797_s14, 256 }
  0x1c   : > { %p799_p1 = scmp.lt.s32.totalorder %s1054_s8, %s797_s14  ;;  %p800_p2 = scmp.lt.s32.totalorder %s798_s15, %s792_s13 }
  0x1d   : > { %714 = vmatpush3.bf16.msra.mxu1 %v713_v24  ;;  %p794_p13 = pnand %p793_p12, %p946_p4 }
  0x1e   : > { %715 = vmatprep.subr.bf16.mxu1 %v873_v18  ;;  %p801_p3 = por %p800_p2, %p799_p1 }
  0x1f   : > { %p795_p0 = pneg %p794_p13 }
  0x21   : > { %717 = vmatpush3.bf16.msra.mxu1 %v716_v27  ;;  %p802_p5 = pnand %p801_p3, %p795_p0 }
  0x22   : > { %718 = vmatprep.subr.bf16.mxu1 %v873_v18 }
  0x25   : > { %720 = vmatpush3.bf16.msra.mxu1 %v719_v30 }
  0x26   : > { %721 = vmatprep.subr.bf16.mxu1 %v873_v18 }
  0x29   : > { %723 = vmatpush3.bf16.msra.mxu1 %v722_v33 }
  0x2a   : > { %724 = vmatprep.subr.bf16.mxu1 %v873_v18 }
  0x2d   : > { %726 = vmatpush3.bf16.msra.mxu1 %v725_v36 }
  0x2e   : > { %727 = vmatprep.subr.bf16.mxu1 %v873_v18 }
  0x31   : > { %729 = vmatpush3.bf16.msra.mxu1 %v728_v39 }
  0xee   : > { %v399_v45 = vpop.f32.mrb[0].mxu0 }
  0xef   : > { %v400_v46 = vadd.f32 %v399_v45, %v322_v44  ;;  %v401_v47 = vpop.f32.mrb[1].mxu0 }
  0xf0   : > { %v402_v55 = vadd.f32 %v401_v47, %v326_v52 }
  0xf1   : > { %v641_v48 = vmul.f32 -1.442695, %v400_v46 }
  0xf3   : > { %788 = vpow2.f32 %v641_v48 }
  0xfd   : > { %v789_v49 = vpop.eup %788 }
  0xfe   : > { %v407_v50 = vadd.f32 1.0, %v789_v49 }
 0x100   : > { %790 = vrcp.f32 %v407_v50 }
 0x10a   : > { %v791_v53 = vpop.eup %790 }
 0x10b   : > { %v410_v54 = vmul.f32 %v791_v53, %v400_v46 }
 0x10d   : > { %v411_v56 = vmul.f32 %v410_v54, %v402_v55 }
 0x10f   : > { %696 = vmatmul.mubr.f32.vlgmr.msra.gmra.mrb[0].mxu1 %v411_v56 }
 0x1e2   : > { %v495_v58 = vpop.f32.mrb[0].mxu1 }
 0x1e3   : > { %v499_v59 = vadd.f32 %v495_v58, %v412_v57  ;;  %v697_v60 = vpop.f32.mrb[1].mxu1 }
 0x1e5   : > { %500 = vst.msk [vmem:[#allocation2] sm:$0xff] %vm306_vm0, %v499_v59 }
 0x1ec   : > { %v504_v61 = vld [vmem:[#allocation2] sm:$0xff] }
 0x1ed   : > { %505 = vst.msk [vmem:[%s273_s7] sm:$0xff] %vm306_vm0, %v504_v61 }
 0x1ee   : > { %805 = shalt.err (!%p802_p5)
}
 0x1ef   : > { %s806_s16 = scalar_lea.hbm %s1052_s11, 128  ;;  %s810_s25 = scalar_lea.hbm %s1105_s5, 256 }
 0x1f0   : > { %p807_p6 = scmp.ne.s32.totalorder %s1052_s11, %s806_s16  ;;  %p811_p10 = scmp.lt.u32.totalorder %s1052_s11, %s1105_s5 }
 0x1f1   : > { %p812_p11 = scmp.lt.u32.totalorder %s810_s25, %s806_s16  ;;  %p814_p13 = scmp.lt.u32.totalorder %s806_s16, %s1052_s11 }
 0x1f2   : > { %p808_p7 = pnand %p807_p6, %p946_p4 }
 0x1f3   : > { %p813_p12 = por %p812_p11, %p811_p10 }
 0x1f4   : > { %p809_p9 = pneg %p808_p7 }
 0x1f5   : > { %p815_p0 = por %p814_p13, %p813_p12 }
 0x1f7   : > { %p816_p1 = pnand %p815_p0, %p809_p9 }
 0x1f9   : > { %819 = shalt.err (!%p816_p1)
}
 0x1fa   : > { %730 = dma.vmem_to_hbm [thread:$0]  (%p946_p4), %s1054_s8, 128, %s1052_s11, %s507_s12  }
 0x1fb PF: > { %p736_p2 = scmp.ge.s32.totalorder %s870_s23, 2  ;;  %s532_s7 = sand.u32 1, %s850_s18  }
 0x1fc   : > { %s533_s9 = scalar_lea.sflag [#allocation4], %s532_s7 }
 0x1fd   : > { %p733_p3 = pnand %p736_p2, %p953_p8 }
 0x1ff   : > { %845 = dma.done.wait (!%p733_p3), %s533_s9, 128  }
 0x200   : > { %847 = vsyncadd (!%p733_p3), %s533_s9, 4294967168  ;;  %s18_s23 = sadd.s32 1, %s870_s23   ;;  %s1108_s18 = smov %s854_s19 }
 0x201   : > { %p15_p5 = scmp.ge.s32.totalorder %s18_s23, 4   ;;  %s1109_s19 = smov %s858_s20 }
 0x202   : > { %s1110_s20 = smov %s959_s6  ;;  %s1111_s21 = smov %s866_s22 }
 0x203   : > { %s1112_s22 = smov %s1114_s26  ;;  %17 = sbr.rel (!%p15_p5) target bundleno = 4 (0x4), region = 92 }
 0x20a   :  { %538 = vsyncpa [#allocation4], 1 }
 0x20b   :  { %540 = vsyncpa [#allocation4 + $0x1], 1 }

</bundles_post_ra>
